<compile_context>
chip_gen: v7x
topology: tpu7x:2x2x1
jax: 0.10.0
libtpu: 0.0.40
codegen_flags: <defaults>
</compile_context>

<pallas_src>
import jax
import jax.numpy as jnp
import numpy as np
from jax.experimental import pallas as pl
from jax.experimental.pallas import tpu as pltpu


# ---------------------------------------------------------------------------
# Fused forward kernel: one batch tile per grid step.
# ---------------------------------------------------------------------------
def dqn_kernel(x_ref, w1_ref, b1_ref, w2_ref, b2_ref, w3t_ref, b3_ref, o_ref):
    x = x_ref[...]                                     # (bt, in_dim)  f32

    # ---- layer1: Linear(in_dim -> hidden) + ReLU  (MXU, tiny K) -----------
    h1 = jnp.dot(x, w1_ref[...], preferred_element_type=jnp.float32)
    h1 = jnp.maximum(h1 + b1_ref[...], 0.0)            # (bt, hidden)

    # ---- layer2: Linear(hidden -> hidden) + ReLU  (64x64 MXU) -------------
    h2 = jnp.dot(h1, w2_ref[...], preferred_element_type=jnp.float32)
    h2 = jnp.maximum(h2 + b2_ref[...], 0.0)            # (bt, hidden)

    # ---- output layer: Linear(hidden -> out_dim), no activation -----------
    # VPU multiply + lane (XLU) reduce per output column; out_dim is tiny
    # (1 for DQNetwork), so this replaces a zero-padded MXU pass and keeps
    # the HBM writeback narrow.
    w3t = w3t_ref[...]                                  # (out_dim, hidden)
    out_dim = w3t.shape[0]
    cols = [
        jnp.sum(h2 * w3t[j:j + 1, :], axis=-1, keepdims=True)   # (bt, 1)
        for j in range(out_dim)                                  # static unroll
    ]
    out = cols[0] if out_dim == 1 else jnp.concatenate(cols, axis=-1)
    o_ref[...] = out + b3_ref[...]                      # (bt, out_dim) narrow store


def _round_up(n, m):
    return ((n + m - 1) // m) * m


def prepare_params(params):
    """One-time conversion of parameters into the kernel layout.

    Hoisted out of dqnetwork_forward so the per-call inference path carries
    no extra XLA ops (DQN forward runs in a tight loop).
    """
    w1, b1, w2, b2, w3, b3 = params
    w3t = jnp.transpose(w3)            # (hidden, out_dim) -> (out_dim, hidden)
    return (w1, b1, w2, b2, w3t, b3)


def dqnetwork_forward(x, kparams, *, max_batch_tile=4096, min_grid_steps=2):
    """x: [B, input_dim] float32; kparams from prepare_params().
    Returns [B, output_dim] float32."""
    w1, b1, w2, b2, w3t, b3 = kparams
    B, in_dim = x.shape
    hidden = w1.shape[1]
    out_dim = w3t.shape[0]

    # Batch tiling: guarantee >= min_grid_steps grid steps whenever the batch
    # is big enough (so the "parallel" axis can use both v7x TensorCores),
    # capped at max_batch_tile rows per step.  Ragged batches are padded.
    B8 = _round_up(B, 8)
    if B8 // 8 < min_grid_steps:
        bt = B8                                         # too small to split
    else:
        bt = min(max_batch_tile, _round_up(pl.cdiv(B8, min_grid_steps), 8))
    Bp = _round_up(B, bt)
    if Bp != B:
        x = jnp.pad(x, ((0, Bp - B), (0, 0)))
    grid = (Bp // bt,)

    out = pl.pallas_call(
        dqn_kernel,
        out_shape=jax.ShapeDtypeStruct((Bp, out_dim), jnp.float32),
        grid_spec=pl.GridSpec(
            grid=grid,
            in_specs=[
                # activations: tiled over batch
                pl.BlockSpec((bt, in_dim), lambda i: (i, 0)),
                # parameters: full arrays, resident every step
                pl.BlockSpec((in_dim, hidden), lambda i: (0, 0)),
                pl.BlockSpec((1, hidden), lambda i: (0, 0)),
                pl.BlockSpec((hidden, hidden), lambda i: (0, 0)),
                pl.BlockSpec((1, hidden), lambda i: (0, 0)),
                pl.BlockSpec((out_dim, hidden), lambda i: (0, 0)),
                pl.BlockSpec((1, out_dim), lambda i: (0, 0)),
            ],
            # narrow (bt, out_dim) writeback; last dim == full array dim is legal
            out_specs=pl.BlockSpec((bt, out_dim), lambda i: (i, 0)),
        ),
        compiler_params=pltpu.CompilerParams(
            dimension_semantics=("parallel",),     # shard batch tiles across v7x's 2 TCs
            vmem_limit_bytes=32 * 1024 * 1024,     # explicit budget; ~14 MiB used at bt=4096
        ),
    )(x, w1, b1, w2, b2, w3t, b3)

    return out[:B, :]


# ---------------------------------------------------------------------------
# Deterministic parameter init (matches PyTorch xavier_uniform_ + zero bias).
# ---------------------------------------------------------------------------
def xavier_uniform(key, fan_in, fan_out):
    bound = float(np.sqrt(6.0 / (fan_in + fan_out)))
    # stored as [in, out] so the kernel can do x @ W
    return jax.random.uniform(
        key, (fan_in, fan_out), dtype=jnp.float32, minval=-bound, maxval=bound
    )


def init_params(key, input_dim=4, hidden_dim=64, output_dim=1):
    k1, k2, k3 = jax.random.split(key, 3)
    w1 = xavier_uniform(k1, input_dim, hidden_dim)
    b1 = jnp.zeros((1, hidden_dim), jnp.float32)
    w2 = xavier_uniform(k2, hidden_dim, hidden_dim)
    b2 = jnp.zeros((1, hidden_dim), jnp.float32)
    w3 = xavier_uniform(k3, hidden_dim, output_dim)
    b3 = jnp.zeros((1, output_dim), jnp.float32)
    return (w1, b1, w2, b2, w3, b3)


def reference_forward(x, params):
    w1, b1, w2, b2, w3, b3 = params
    h1 = jnp.maximum(x @ w1 + b1, 0.0)
    h2 = jnp.maximum(h1 @ w2 + b2, 0.0)
    return h2 @ w3 + b3


if __name__ == "__main__":
    key = jax.random.PRNGKey(0)
    pkey, xkey = jax.random.split(key)

    input_dim, hidden_dim, output_dim = 4, 64, 1
    batch = 32  # small batch; grid gets 2 steps of 16 rows each

    params = init_params(pkey, input_dim, hidden_dim, output_dim)
    kparams = prepare_params(params)     # one-time kernel-layout prep
    x = jax.random.normal(xkey, (batch, input_dim), dtype=jnp.float32)

    out = dqnetwork_forward(x, kparams)
    out = jax.block_until_ready(out)

    ref = jax.block_until_ready(reference_forward(x, params))
    assert out.shape == (batch, output_dim)
    np.testing.assert_allclose(np.asarray(out), np.asarray(ref), rtol=1e-5, atol=1e-5)

    print("KERNEL_OK")
</pallas_src>

<mosaic_0001>
module attributes {stable_mosaic.version = 11 : i64} {
  func.func @dqn_kernel(%arg0: i32, %arg1: memref<16x4xf32, #tpu.memory_space<vmem>>, %arg2: memref<4x64xf32, #tpu.memory_space<vmem>>, %arg3: memref<1x64xf32, #tpu.memory_space<vmem>>, %arg4: memref<64x64xf32, #tpu.memory_space<vmem>>, %arg5: memref<1x64xf32, #tpu.memory_space<vmem>>, %arg6: memref<1x64xf32, #tpu.memory_space<vmem>>, %arg7: memref<1x1xf32, #tpu.memory_space<vmem>>, %arg8: memref<16x1xf32, #tpu.memory_space<vmem>>) attributes {dimension_semantics = [#tpu.dimension_semantics<parallel>], iteration_bounds = array<i64: 2>, scalar_prefetch = 0 : i64, scratch_operands = 0 : i64, tpu.core_type = #tpu.core_type<tc>, window_params = [{transform_indices = @transform_0, window_bounds = array<i64: 16, 4>}, {pipeline_mode = #tpu.pipeline_mode<synchronous>, transform_indices = @transform_1, window_bounds = array<i64: 4, 64>}, {pipeline_mode = #tpu.pipeline_mode<synchronous>, transform_indices = @transform_2, window_bounds = array<i64: 1, 64>}, {pipeline_mode = #tpu.pipeline_mode<synchronous>, transform_indices = @transform_3, window_bounds = array<i64: 64, 64>}, {pipeline_mode = #tpu.pipeline_mode<synchronous>, transform_indices = @transform_4, window_bounds = array<i64: 1, 64>}, {pipeline_mode = #tpu.pipeline_mode<synchronous>, transform_indices = @transform_5, window_bounds = array<i64: 1, 64>}, {pipeline_mode = #tpu.pipeline_mode<synchronous>, transform_indices = @transform_6, window_bounds = array<i64: 1, 1>}, {transform_indices = @transform_7, window_bounds = array<i64: 16, 1>}]} {
    %c0 = arith.constant 0 : index
    %c0_0 = arith.constant 0 : index
    %0 = vector.load %arg1[%c0, %c0_0] : memref<16x4xf32, #tpu.memory_space<vmem>>, vector<16x4xf32>
    %c0_1 = arith.constant 0 : index
    %c0_2 = arith.constant 0 : index
    %1 = vector.load %arg2[%c0_1, %c0_2] : memref<4x64xf32, #tpu.memory_space<vmem>>, vector<4x64xf32>
    %cst = arith.constant dense<0.000000e+00> : vector<16x64xf32>
    %2 = tpu.matmul %0, %1, %cst {dimension_numbers = #tpu.dot_dimension_numbers<[1], [0], [0], [1], [0, 0, 1, 1], [], []>} : vector<16x4xf32>, vector<4x64xf32>, vector<16x64xf32> -> vector<16x64xf32>
    %c0_3 = arith.constant 0 : index
    %c0_4 = arith.constant 0 : index
    %3 = vector.load %arg3[%c0_3, %c0_4] : memref<1x64xf32, #tpu.memory_space<vmem>>, vector<1x64xf32>
    %4 = vector.broadcast %3 : vector<1x64xf32> to vector<16x64xf32>
    %5 = arith.addf %2, %4 : vector<16x64xf32>
    %cst_5 = arith.constant 0.000000e+00 : f32
    %6 = vector.broadcast %cst_5 : f32 to vector<16x64xf32>
    %7 = arith.maximumf %5, %6 : vector<16x64xf32>
    %c0_6 = arith.constant 0 : index
    %c0_7 = arith.constant 0 : index
    %8 = vector.load %arg4[%c0_6, %c0_7] : memref<64x64xf32, #tpu.memory_space<vmem>>, vector<64x64xf32>
    %cst_8 = arith.constant dense<0.000000e+00> : vector<16x64xf32>
    %9 = tpu.matmul %7, %8, %cst_8 {dimension_numbers = #tpu.dot_dimension_numbers<[1], [0], [0], [1], [0, 0, 1, 1], [], []>} : vector<16x64xf32>, vector<64x64xf32>, vector<16x64xf32> -> vector<16x64xf32>
    %c0_9 = arith.constant 0 : index
    %c0_10 = arith.constant 0 : index
    %10 = vector.load %arg5[%c0_9, %c0_10] : memref<1x64xf32, #tpu.memory_space<vmem>>, vector<1x64xf32>
    %11 = vector.broadcast %10 : vector<1x64xf32> to vector<16x64xf32>
    %12 = arith.addf %9, %11 : vector<16x64xf32>
    %cst_11 = arith.constant 0.000000e+00 : f32
    %13 = vector.broadcast %cst_11 : f32 to vector<16x64xf32>
    %14 = arith.maximumf %12, %13 : vector<16x64xf32>
    %c0_12 = arith.constant 0 : index
    %c0_13 = arith.constant 0 : index
    %15 = vector.load %arg6[%c0_12, %c0_13] : memref<1x64xf32, #tpu.memory_space<vmem>>, vector<1x64xf32>
    %16 = vector.broadcast %15 : vector<1x64xf32> to vector<16x64xf32>
    %17 = arith.mulf %14, %16 : vector<16x64xf32>
    %cst_14 = arith.constant dense<0.000000e+00> : vector<16xf32>
    %18 = vector.multi_reduction <add>, %17, %cst_14 [1] : vector<16x64xf32> to vector<16xf32>
    %19 = vector.shape_cast %18 : vector<16xf32> to vector<16x1xf32>
    %c0_15 = arith.constant 0 : index
    %c0_16 = arith.constant 0 : index
    %20 = vector.load %arg7[%c0_15, %c0_16] : memref<1x1xf32, #tpu.memory_space<vmem>>, vector<1x1xf32>
    %21 = vector.broadcast %20 : vector<1x1xf32> to vector<16x1xf32>
    %22 = arith.addf %19, %21 : vector<16x1xf32>
    %c0_17 = arith.constant 0 : index
    %c0_18 = arith.constant 0 : index
    %23 = vector.load %arg8[%c0_17, %c0_18] : memref<16x1xf32, #tpu.memory_space<vmem>>, vector<16x1xf32>
    tpu.vector_store %arg8[%c0_17, %c0_18], %22 {strides = array<i32>} : memref<16x1xf32, #tpu.memory_space<vmem>>, vector<16x1xf32>,
    return
  }
  func.func @transform_0(%arg0: i32) -> (i32, i32) {
    %c0_i32 = arith.constant 0 : i32
    %c0_i32_0 = arith.constant 0 : i32
    return %arg0, %c0_i32 : i32, i32
  }
  func.func @transform_1(%arg0: i32) -> (i32, i32) {
    %c0_i32 = arith.constant 0 : i32
    %c0_i32_0 = arith.constant 0 : i32
    %c0_i32_1 = arith.constant 0 : i32
    return %c0_i32, %c0_i32_0 : i32, i32
  }
  func.func @transform_2(%arg0: i32) -> (i32, i32) {
    %c0_i32 = arith.constant 0 : i32
    %c0_i32_0 = arith.constant 0 : i32
    %c0_i32_1 = arith.constant 0 : i32
    return %c0_i32, %c0_i32_0 : i32, i32
  }
  func.func @transform_3(%arg0: i32) -> (i32, i32) {
    %c0_i32 = arith.constant 0 : i32
    %c0_i32_0 = arith.constant 0 : i32
    %c0_i32_1 = arith.constant 0 : i32
    return %c0_i32, %c0_i32_0 : i32, i32
  }
  func.func @transform_4(%arg0: i32) -> (i32, i32) {
    %c0_i32 = arith.constant 0 : i32
    %c0_i32_0 = arith.constant 0 : i32
    %c0_i32_1 = arith.constant 0 : i32
    return %c0_i32, %c0_i32_0 : i32, i32
  }
  func.func @transform_5(%arg0: i32) -> (i32, i32) {
    %c0_i32 = arith.constant 0 : i32
    %c0_i32_0 = arith.constant 0 : i32
    %c0_i32_1 = arith.constant 0 : i32
    return %c0_i32, %c0_i32_0 : i32, i32
  }
  func.func @transform_6(%arg0: i32) -> (i32, i32) {
    %c0_i32 = arith.constant 0 : i32
    %c0_i32_0 = arith.constant 0 : i32
    %c0_i32_1 = arith.constant 0 : i32
    return %c0_i32, %c0_i32_0 : i32, i32
  }
  func.func @transform_7(%arg0: i32) -> (i32, i32) {
    %c0_i32 = arith.constant 0 : i32
    %c0_i32_0 = arith.constant 0 : i32
    return %arg0, %c0_i32 : i32, i32
  }
}

</mosaic_0001>

<bundles_post_ra>
// kernel: tpu_custom_call.1
= control target key start
LH: loop header
LB: loop body
LE: loop exit
PB: predicated region body
PF: predicated region fallthrough
CT: control target
= control target key end

     0   :  { %s855_s0 = inlined_call_operand.vmem [shape: f32[32,4], index: 0, kind: input, shape index: {}]   ;;  %s856_s1 = inlined_call_operand.vmem [shape: f32[4,64], index: 1, kind: input, shape index: {}]   ;;  %s857_s2 = inlined_call_operand.vmem [shape: f32[1,64], index: 2, kind: input, shape index: {}]   ;;  %s858_s3 = inlined_call_operand.hbm [shape: f32[64,64], index: 3, kind: input, shape index: {}]   ;;  %s859_s4 = inlined_call_operand.vmem [shape: f32[1,64], index: 4, kind: input, shape index: {}]   ;;  %s860_s5 = inlined_call_operand.vmem [shape: f32[1,64], index: 5, kind: input, shape index: {}]   ;;  %s861_s6 = inlined_call_operand.<no memory space> [shape: f32[1,1], index: 6, kind: input, shape index: {}]   ;;  %s862_s7 = inlined_call_operand.vmem [shape: f32[32,1], index: 7, kind: output, shape index: {}]  }
   0x1   :  { %v12_v0 = vstv %s861_s6 }
   0x2   :  { %13 = vst [vmem:[#allocation2] sm:$0x1] %v12_v0 }
   0x3   :  { %14 = vsyncpa [#allocation4], 0  ;;  %s773_s26 = smov 0  }
   0x4 LB: > { %s591_s27 = sadd.s32 4294967295, %s725_s26   ;;  %p593_p0 = scmp.ge.s32.totalorder %s725_s26, 1  ;;  %s725_s26 = sphi %s773_s26, %s20_s26  }
   0x5   : > { %p203_p1 = scmp.lt.s32.totalorder %s725_s26, 3  ;;  %s727_s28 = smov [#allocation3]  }
   0x6   : > { %s221_s29 = sshll.u32 %s727_s28, 4  ;;  %p787_p3 = scmp.eq.s32.totalorder %s591_s27, 0  ;;  %s222_s29 = int_to_ptr.vmem [resolvable:$true] %s221_s29 }
   0x7   : > { %p781_p2 = pnand %p593_p0, %p203_p1  ;;  %s687_s11 = scalar_lea.hbm %s858_s3, 1024 }
   0x8   : > { %s867_s30 = scalar_select %p787_p3, 1, 0 }
   0x9   : > { %s866_s6 = scalar_select %p781_p2, 1, 0 }
   0xa   : > { %p670_p4 = pneg %p781_p2  ;;  %p688_p6 = scmp.ne.s32.totalorder %s858_s3, %s687_s11 }
   0xb   : > { %p694_p10 = scmp.lt.u32.totalorder %s687_s11, %s858_s3 }
   0xc   : > { %p795_p5 = pnand %p787_p3, %p670_p4 }
   0xe   : > { %p689_p7 = pneg %p795_p5 }
  0x10   : > { %p690_p8 = pnand %p689_p7, %p688_p6 }
  0x12   : > { %p691_p9 = pneg %p690_p8 }
  0x14   : > { %p696_p11 = pnand %p694_p10, %p691_p9 }
  0x16   : > { %699 = shalt.err (!%p696_p11)
}
  0x17   : > { %s700_s16 = scalar_lea.vmem %s222_s29, 1024  ;;  %p708_p1 = scmp.lt.s32.totalorder %s222_s29, %s222_s29 }
  0x18   : > { %p701_p12 = scmp.ne.s32.totalorder %s222_s29, %s700_s16  ;;  %p709_p4 = scmp.lt.s32.totalorder %s700_s16, %s700_s16 }
  0x1a   : > { %p703_p13 = pnand %p701_p12, %p689_p7  ;;  %p710_p3 = por %p709_p4, %p708_p1 }
  0x1c   : > { %p704_p0 = pneg %p703_p13 }
  0x1e   : > { %p711_p2 = pnand %p710_p3, %p704_p0 }
  0x20   : > { %714 = shalt.err (!%p711_p2)
}
  0x21   : > { %s728_s17 = smov 128   ;;  %s729_s18 = smov 8  }
  0x22   : > { %673 = dma.hbm_to_vmem [thread:$0]  (!%p795_p5), %s858_s3, 1024, %s222_s29, [#allocation4], %s728_s17, %s728_s17, %s729_s18  }
  0x23   : > { %p869_p6 = scmp.ne.s32.totalorder %s866_s6, 0 }
  0x24   : > { %p870_p8 = scmp.ne.s32.totalorder (!%p869_p6), %s867_s30, 0 }
  0x25   : > { %255 = sbr.rel (%p869_p6) target bundleno = 640 (0x280), region = 48 }
  0x2c   : > { %720 = dma.done.wait (%p870_p8), [#allocation4], 1024  }
  0x2d   : > { %722 = vsyncadd (%p870_p8), [#allocation4], 4294966272  ;;  %s598_s21 = sshll.u32 %s591_s27, 1  ;;  %vm316_vm0 = vcmask 1043456   ;;  %vm309_vm1 = vcmask 31744   ;;  %v397_v4 = vld [vmem:[#allocation3] sm:$0xff] }
  0x2e   : > { %p288_p2 = scmp.lt.s32.totalorder %s598_s21, 3  ;;  %v301_v1 = vld [vmem:[%s856_s1] sm:$0xf]  ;;  %v398_v5 = vld [vmem:[#allocation3 + $0x8] sm:$0xff]  ;;  %v399_v6 = vld [vmem:[#allocation3 + $0x10] sm:$0xff]  ;;  %vm412_vm2 = vcmask 523264  }
  0x2f   : > { %626 = vmatprep.subr.msk.mxu0 %vm316_vm0, %v301_v1  ;;  %v650_v7 = vpack.c.bf16 %v398_v5, %v397_v4  ;;  %v400_v8 = vld [vmem:[#allocation3 + $0x18] sm:$0xff]  ;;  %v401_v10 = vld [vmem:[#allocation3 + $0x20] sm:$0xff]  ;;  %v402_v11 = vld [vmem:[#allocation3 + $0x28] sm:$0xff]  ;;  %vm520_vm3 = vcmask 7168  }
  0x30   : > { %s872_s21 = smov (!%p288_p2, %s598_s21), 3  ;;  %627 = vmatpush3.msk.msra.mxu0 %vm316_vm0, %v301_v1  ;;  %v654_v9 = vpack.c.bf16 %v400_v8, %v399_v6  ;;  %v658_v12 = vpack.c.bf16 %v402_v11, %v401_v10  ;;  %v403_v13 = vld [vmem:[#allocation3 + $0x30] sm:$0xff]  ;;  %v404_v14 = vld [vmem:[#allocation3 + $0x38] sm:$0xff] }
  0x31   : > { %s599_s22 = sshll.u32 %s872_s21, 3  ;;  %651 = vmatprep.subr.bf16.mxu1 %v650_v7  ;;  %v662_v15 = vpack.c.bf16 %v404_v14, %v403_v13  ;;  %v602_v16 = vld [vmem:[%s857_s2] ss:$0 sm:$0xff] }
  0x32   : > { %s291_s25 = scalar_lea.vmem %s855_s0, %s599_s22  ;;  %653 = vmatpush3.bf16.msra.mxu1 %v650_v7  ;;  %v606_v23 = vld [vmem:[%s859_s4] ss:$0 sm:$0xff]  ;;  %s297_s13 = scalar_lea.vmem %s862_s7, %s599_s22 }
  0x33   : > { %v299_v2 = vld [vmem:[%s291_s25] sm:$0xff]  ;;  %v300_v3 = vld [vmem:[%s291_s25 + $0x8] sm:$0xff]  ;;  %655 = vmatprep.subr.bf16.mxu1 %v654_v9 }
  0x34   : > { %628 = vmatprep.mubr.msk.f32.mxu0 %vm309_vm1, %v299_v2  ;;  %v609_v28 = vld [vmem:[%s860_s5] ss:$0 sm:$0xff] }
  0x35   : > { %629 = vmatmul.mubr.msk.f32.vlgmr.msra.gmra.mrb[0].mxu0 %vm309_vm1, %v300_v3  ;;  %v610_v35 = vld [vmem:[#allocation2] ss:$0 sm:$0xff] }
  0x36   : > { %657 = vmatpush3.bf16.msra.mxu1 %v654_v9 }
  0x37   : > { %659 = vmatprep.subr.bf16.mxu1 %v658_v12 }
  0x3a   : > { %661 = vmatpush3.bf16.msra.mxu1 %v658_v12 }
  0x3b   : > { %663 = vmatprep.subr.bf16.mxu1 %v662_v15 }
  0x3e   : > { %665 = vmatpush3.bf16.msra.mxu1 %v662_v15 }
 0x108   : > { %v630_v17 = vpop.f32.mrb[0].mxu0 }
 0x109   : > { %v392_v18 = vadd.f32 %v630_v17, %v602_v16  ;;  %v386_v19 = vpop.f32.mrb[1].mxu0 }
 0x10a   : > { %v387_v20 = vadd.f32 %v602_v16, %v386_v19 }
 0x10b   : > { %v396_v22 = vmax.f32 %v392_v18, 0.0 }
 0x10c   : > { %v395_v21 = vmax.f32 %v387_v20, 0.0 }
 0x10e   : > { %647 = vmatprep.mubr.msk.f32.mxu1 %vm412_vm2, %v395_v21 }
 0x10f   : > { %648 = vmatmul.mubr.msk.f32.vlgmr.msra.gmra.mrb[0].mxu1 %vm412_vm2, %v396_v22 }
 0x1e2   : > { %v649_v24 = vpop.f32.mrb[0].mxu1 }
 0x1e3   : > { %v491_v25 = vadd.f32 %v649_v24, %v606_v23  ;;  %v485_v26 = vpop.f32.mrb[1].mxu1 }
 0x1e4   : > { %v486_v27 = vadd.f32 %v606_v23, %v485_v26 }
 0x1e5   : > { %v495_v29 = vmax.f32 %v491_v25, 0.0 }
 0x1e6   : > { %v494_v30 = vmax.f32 %v486_v27, 0.0 }
 0x1e7   : > { %v504_v33 = vmul.f32 %v609_v28, %v495_v29 }
 0x1e8   : > { %v503_v31 = vmul.f32 %v609_v28, %v494_v30 }
 0x1e9   : > { %v508_v34 = vsel %vm412_vm2, %v504_v33, 0.0 }
 0x1ea   : > { %v505_v32 = vsel %vm412_vm2, %v503_v31, 0.0 }
 0x1eb   : > { %506 = vadd.xlane.f32.xlu0 %v505_v32 }
 0x1ef   : > { %509 = vadd.xlane.f32.xlu0 %v508_v34 }
 0x278   : > { %v507_v36 = vpop.xlane.xlu0 %506 }
 0x279   : > { %v518_v37 = vadd.f32 %v610_v35, %v507_v36 }
 0x27b   : > { %521 = vst.msk [vmem:[%s297_s13] sm:$0xff] %vm520_vm3, %v518_v37 }
 0x27c   : > { %v510_v38 = vpop.xlane.xlu0 %509 }
 0x27d   : > { %v519_v39 = vadd.f32 %v610_v35, %v510_v38 }
 0x27f   : > { %522 = vst.msk [vmem:[%s297_s13 + $0x8] sm:$0xff] %vm520_vm3, %v519_v39 }
 0x280 PF: > { %s20_s26 = sadd.s32 1, %s725_s26  }
 0x281   : > { %p17_p3 = scmp.ge.s32.totalorder %s20_s26, 4  }
 0x283   :  { %19 = sbr.rel (!%p17_p3) target bundleno = 4 (0x4), region = 83 }
 0x28a   :  { %545 = vsyncpa [#allocation4], 1 }
 0x28b   :  { %547 = vsyncpa [#allocation4 + $0x1], 1 }

</bundles_post_ra>
